<compile_context>
chip_gen: v7x
topology: tpu7x:2x2x1
jax: 0.10.0
libtpu: 0.0.40
codegen_flags: <defaults>
</compile_context>

<pallas_src>
import functools

import jax
import jax.numpy as jnp
from jax.experimental import pallas as pl
from jax.experimental.pallas import tpu as pltpu


def _grid_head_kernel(x_ref, w_ref, b_ref, o_ref, *, sig_lo):
    # x_ref: (1, Cin, TM)   w_ref: (Cout, Cin)   b_ref: (Cout, 1)
    # o_ref: (1, Cout, TM)
    x = x_ref[0]                                                   # (Cin, TM)
    y = jnp.dot(w_ref[...], x, preferred_element_type=jnp.float32)  # (Cout, TM)
    y = y + b_ref[...]                                             # lane-broadcast bias
    # Full lane-dense store of the linear output.
    o_ref[0] = y
    # Sigmoid only on the two bbox x/y-offset channels (static sublane slice).
    o_ref[0, sig_lo:sig_lo + 2, :] = jax.nn.sigmoid(y[sig_lo:sig_lo + 2, :])


def _pick_tile(hw, max_tile=2048):
    """Largest multiple-of-128 divisor of hw (capped), else full extent."""
    if hw % 128 == 0:
        tm = min(max_tile, hw)
        tm -= tm % 128
        while tm >= 128:
            if hw % tm == 0:
                return tm
            tm -= 128
    return hw


def grid_forward(x_nchw, w_oc, b_o, nclasses):
    """x_nchw: (N, Cin, H, W) f32; w_oc: (Cout, Cin); b_o: (Cout,).
    Cout layout: [scores(1) | labels(nclasses) | bboxes(4)].
    Returns dict: scores (N,1,H,W), labels (N,nclasses,H,W), bboxes (N,4,H,W)."""
    N, Cin, H, W = x_nchw.shape
    Cout = w_oc.shape[0]
    HW = H * W
    TM = _pick_tile(HW)
    sig_lo = 1 + nclasses  # global channel index of bbox x-offset

    x3 = x_nchw.reshape(N, Cin, HW)      # free view of NCHW
    b2 = b_o.reshape(Cout, 1)

    out3 = pl.pallas_call(
        functools.partial(_grid_head_kernel, sig_lo=sig_lo),
        out_shape=jax.ShapeDtypeStruct((N, Cout, HW), jnp.float32),
        grid=(N, HW // TM),
        in_specs=[
            pl.BlockSpec((1, Cin, TM), lambda n, t: (n, 0, t)),
            pl.BlockSpec((Cout, Cin), lambda n, t: (0, 0)),
            pl.BlockSpec((Cout, 1), lambda n, t: (0, 0)),
        ],
        out_specs=pl.BlockSpec((1, Cout, TM), lambda n, t: (n, 0, t)),
        compiler_params=pltpu.CompilerParams(
            dimension_semantics=("parallel", "parallel")),
    )(x3, w_oc, b2)

    out_nchw = out3.reshape(N, Cout, H, W)   # free view back to NCHW
    scores = out_nchw[:, 0:1]
    labels = out_nchw[:, 1:1 + nclasses]
    bboxes = out_nchw[:, 1 + nclasses:1 + nclasses + 4]
    return {"scores": scores, "labels": labels, "bboxes": bboxes}


def init_params(key, in_channels, nclasses):
    """Synthetic init for the three fused 1x1 convs.
    Weight layout matches torch Conv2d: (Cout, Cin); Cout = [scores|labels|bboxes]."""
    cout = 1 + nclasses + 4
    kw, kb = jax.random.split(key)
    bound = 1.0 / (in_channels ** 0.5)  # Kaiming-uniform-ish, fan_in = Cin*1*1
    w = jax.random.uniform(kw, (cout, in_channels), jnp.float32, -bound, bound)
    b = jax.random.uniform(kb, (cout,), jnp.float32, -bound, bound)
    return w, b


if __name__ == "__main__":
    # Small shapes consistent with the module: batch=2, in_channels=4,
    # nclasses=3, spatial grid 16x16 (img_size/anchor/scale only matter for
    # post_process / loss, not for forward()).
    N, Cin, H, W = 2, 4, 16, 16
    nclasses = 3

    key = jax.random.PRNGKey(0)
    kx, kp = jax.random.split(key)
    x = jax.random.normal(kx, (N, Cin, H, W), dtype=jnp.float32)
    w_oc, b_o = init_params(kp, Cin, nclasses)

    preds = grid_forward(x, w_oc, b_o, nclasses)
    jax.block_until_ready(preds)

    # Pure-JAX reference of the fused-conv semantics.
    y_ref = jnp.einsum("oc,nchw->nohw", w_oc, x,
                       precision=jax.lax.Precision.HIGHEST)
    y_ref = y_ref + b_o[None, :, None, None]
    c0, c1 = 1 + nclasses, 2 + nclasses
    y_ref = y_ref.at[:, c0].set(jax.nn.sigmoid(y_ref[:, c0]))
    y_ref = y_ref.at[:, c1].set(jax.nn.sigmoid(y_ref[:, c1]))
    ref = {
        "scores": y_ref[:, 0:1],
        "labels": y_ref[:, 1:1 + nclasses],
        "bboxes": y_ref[:, 1 + nclasses:1 + nclasses + 4],
    }
    for k in ("scores", "labels", "bboxes"):
        assert preds[k].shape == ref[k].shape
        assert jnp.allclose(preds[k], ref[k], atol=1e-4, rtol=1e-4), k

    # TODO(synk): post_process / compute_loss depend on the external `od`
    # package (grid masking, bbox transforms) and are not part of forward();
    # not implemented here.
    print("KERNEL_OK")
</pallas_src>

<mosaic_0001>
module attributes {stable_mosaic.version = 11 : i64} {
  func.func @_grid_head_kernel(%arg0: i32, %arg1: i32, %arg2: memref<1x4x256xf32, #tpu.memory_space<vmem>>, %arg3: memref<8x4xf32, #tpu.memory_space<vmem>>, %arg4: memref<8x1xf32, #tpu.memory_space<vmem>>, %arg5: memref<1x8x256xf32, #tpu.memory_space<vmem>>) attributes {dimension_semantics = [#tpu.dimension_semantics<parallel>, #tpu.dimension_semantics<parallel>], iteration_bounds = array<i64: 2, 1>, scalar_prefetch = 0 : i64, scratch_operands = 0 : i64, tpu.core_type = #tpu.core_type<tc>, window_params = [{transform_indices = @transform_0, window_bounds = array<i64: 1, 4, 256>}, {pipeline_mode = #tpu.pipeline_mode<synchronous>, transform_indices = @transform_1, window_bounds = array<i64: 8, 4>}, {pipeline_mode = #tpu.pipeline_mode<synchronous>, transform_indices = @transform_2, window_bounds = array<i64: 8, 1>}, {transform_indices = @transform_3, window_bounds = array<i64: 1, 8, 256>}]} {
    %c0 = arith.constant 0 : index
    %c0_0 = arith.constant 0 : index
    %c0_1 = arith.constant 0 : index
    %0 = vector.load %arg2[%c0, %c0_0, %c0_1] : memref<1x4x256xf32, #tpu.memory_space<vmem>>, vector<1x4x256xf32>
    %1 = vector.shape_cast %0 : vector<1x4x256xf32> to vector<4x256xf32>
    %c0_2 = arith.constant 0 : index
    %c0_3 = arith.constant 0 : index
    %2 = vector.load %arg3[%c0_2, %c0_3] : memref<8x4xf32, #tpu.memory_space<vmem>>, vector<8x4xf32>
    %cst = arith.constant dense<0.000000e+00> : vector<8x256xf32>
    %3 = tpu.matmul %2, %1, %cst {dimension_numbers = #tpu.dot_dimension_numbers<[1], [0], [0], [1], [0, 0, 1, 1], [], []>} : vector<8x4xf32>, vector<4x256xf32>, vector<8x256xf32> -> vector<8x256xf32>
    %c0_4 = arith.constant 0 : index
    %c0_5 = arith.constant 0 : index
    %4 = vector.load %arg4[%c0_4, %c0_5] : memref<8x1xf32, #tpu.memory_space<vmem>>, vector<8x1xf32>
    %5 = vector.broadcast %4 : vector<8x1xf32> to vector<8x256xf32>
    %6 = arith.addf %3, %5 : vector<8x256xf32>
    %c0_6 = arith.constant 0 : index
    %c0_7 = arith.constant 0 : index
    %c0_8 = arith.constant 0 : index
    %7 = vector.load %arg5[%c0_6, %c0_7, %c0_8] : memref<1x8x256xf32, #tpu.memory_space<vmem>>, vector<1x8x256xf32>
    %8 = vector.shape_cast %7 : vector<1x8x256xf32> to vector<8x256xf32>
    %9 = vector.shape_cast %6 : vector<8x256xf32> to vector<1x8x256xf32>
    tpu.vector_store %arg5[%c0_6, %c0_7, %c0_8], %9 {strides = array<i32>} : memref<1x8x256xf32, #tpu.memory_space<vmem>>, vector<1x8x256xf32>,
    %10 = vector.extract_strided_slice %6 {offsets = [4, 0], sizes = [2, 256], strides = [1, 1]} : vector<8x256xf32> to vector<2x256xf32>
    %11 = arith.negf %10 : vector<2x256xf32>
    %12 = math.exp %11 : vector<2x256xf32>
    %cst_9 = arith.constant 1.000000e+00 : f32
    %13 = vector.broadcast %cst_9 : f32 to vector<2x256xf32>
    %14 = arith.addf %13, %12 : vector<2x256xf32>
    %15 = arith.divf %13, %14 : vector<2x256xf32>
    %c0_10 = arith.constant 0 : index
    %c4 = arith.constant 4 : index
    %c0_11 = arith.constant 0 : index
    %16 = vector.load %arg5[%c0_10, %c4, %c0_11] : memref<1x8x256xf32, #tpu.memory_space<vmem>>, vector<1x2x256xf32>
    %17 = vector.shape_cast %16 : vector<1x2x256xf32> to vector<2x256xf32>
    %18 = vector.shape_cast %15 : vector<2x256xf32> to vector<1x2x256xf32>
    tpu.vector_store %arg5[%c0_10, %c4, %c0_11], %18 {strides = array<i32>} : memref<1x8x256xf32, #tpu.memory_space<vmem>>, vector<1x2x256xf32>,
    return
  }
  func.func @transform_0(%arg0: i32, %arg1: i32) -> (i32, i32, i32) {
    %c0_i32 = arith.constant 0 : i32
    %c0_i32_0 = arith.constant 0 : i32
    return %arg0, %c0_i32, %arg1 : i32, i32, i32
  }
  func.func @transform_1(%arg0: i32, %arg1: i32) -> (i32, i32) {
    %c0_i32 = arith.constant 0 : i32
    %c0_i32_0 = arith.constant 0 : i32
    %c0_i32_1 = arith.constant 0 : i32
    return %c0_i32, %c0_i32_0 : i32, i32
  }
  func.func @transform_2(%arg0: i32, %arg1: i32) -> (i32, i32) {
    %c0_i32 = arith.constant 0 : i32
    %c0_i32_0 = arith.constant 0 : i32
    %c0_i32_1 = arith.constant 0 : i32
    return %c0_i32, %c0_i32_0 : i32, i32
  }
  func.func @transform_3(%arg0: i32, %arg1: i32) -> (i32, i32, i32) {
    %c0_i32 = arith.constant 0 : i32
    %c0_i32_0 = arith.constant 0 : i32
    return %arg0, %c0_i32, %arg1 : i32, i32, i32
  }
}

</mosaic_0001>

<bundles_post_ra>
// kernel: tpu_custom_call.1
= control target key start
LH: loop header
LB: loop body
LE: loop exit
PB: predicated region body
PF: predicated region fallthrough
CT: control target
= control target key end

     0   :  { %8 = vsyncpa [#allocation3], 0  ;;  %s707_s0 = inlined_call_operand.vmem [shape: f32[2,4,256], index: 0, kind: input, shape index: {}]   ;;  %s708_s1 = inlined_call_operand.vmem [shape: f32[8,4], index: 1, kind: input, shape index: {}]   ;;  %s709_s2 = inlined_call_operand.vmem [shape: f32[8,1], index: 2, kind: input, shape index: {}]   ;;  %s710_s3 = inlined_call_operand.hbm [shape: f32[2,8,256], index: 3, kind: output, shape index: {}]  }
   0x1   :  { %10 = vsyncpa [#allocation3 + $0x1], 0  ;;  %s589_s12 = smov 0   ;;  %s591_s13 = smov 0  }
   0x2   :  { %s593_s14 = smov 0   ;;  %s595_s15 = smov 0  }
   0x3   :  { %s597_s16 = smov 0   ;;  %s599_s17 = smov 0  }
   0x4 LB: > { %s399_s18 = sadd.s32 4294967295, %s564_s17   ;;  %s400_s19 = sadd.s32 4294967294, %s564_s17   ;;  %s564_s17 = sphi %s599_s17, %s16_s17   ;;  %s560_s16 = sphi %s597_s16, %s717_s16   ;;  %s556_s15 = sphi %s595_s15, %s716_s15   ;;  %s552_s14 = sphi %s593_s14, %s715_s14   ;;  %s548_s13 = sphi %s591_s13, %s714_s13   ;;  %s544_s12 = sphi %s589_s12, %s713_s12  }
   0x5   : > { %s28_s20 = sadd.s32 1, %s560_s16  ;;  %s107_s21 = sadd.s32 1, %s552_s14 }
   0x6   : > { %p30_p0 = scmp.ge.s32.totalorder %s28_s20, 2  ;;  %p117_p1 = scmp.ne.s32.totalorder %s552_s14, %s548_s13 }
   0x7   : > { %p118_p2 = scmp.eq.s32.totalorder %s399_s18, 1  ;;  %p123_p3 = scmp.ne.s32.totalorder %s548_s13, %s544_s12 }
   0x8   : > { %s719_s20 = smov (%p30_p0, %s28_s20), 0  ;;  %p124_p5 = scmp.eq.s32.totalorder %s400_s19, 1 }
   0x9   : > { %p629_p4 = por %p118_p2, %p117_p1  ;;  %s102_s23 = ssub.s32 %s560_s16, %s719_s20 }
   0xa   : > { %p403_p6 = scmp.ge.s32.totalorder %s564_s17, 1  ;;  %p105_p7 = scmp.eq.s32.totalorder %s102_s23, 0 }
   0xb   : > { %p636_p8 = por %p124_p5, %p123_p3  ;;  %p161_p9 = scmp.lt.s32.totalorder %s564_s17, 3 }
   0xc   : > { %s642_s25 = scalar_select %p105_p7, %s552_s14, %s107_s21  }
   0xd   : > { %p162_p10 = pnand %p403_p6, %p161_p9 }
   0xe   : > { %p190_p11 = scmp.lt.s32.totalorder (!%p162_p10), %s556_s15, 1  ;;  %v566_v0 = vmov (!%p162_p10), 0.0   ;;  %v567_v1 = vmov (!%p162_p10), 0   ;;  %v202_v2 = vld [vmem:[%s709_s2] sm:$0xff] (!%p162_p10)  ;;  %vm214_vm0 = vcmask (!%p162_p10), 1043456   ;;  %vm210_vm1 = vcmask (!%p162_p10), 31744  }
   0xf   : > { %165 = sbr.rel (%p162_p10) target bundleno = 286 (0x11e), region = 32  ;;  %283 = vmatprep.mubr.f32.mxu0 (!%p162_p10), %v566_v0  ;;  %476 = vset.pattern.permute.xlu0 (!%p162_p10), %v567_v1  ;;  %v201_v5 = vld [vmem:[%s708_s1] sm:$0xff] (!%p162_p10)  ;;  %s186_s8 = sand.u32 (!%p162_p10), 1, %s548_s13  }
  0x10   : > { %205 = vperm.xlu0 (!%p162_p10), %476, %v202_v2   ;;  %s404_s9 = sshll.u32 (!%p162_p10), %s186_s8, 4  ;;  %s418_s11 = sshll.u32 (!%p162_p10), %s556_s15, 8 }
  0x11   : > { %s188_s10 = scalar_lea.vmem (!%p162_p10), [#allocation2], %s404_s9  ;;  %s660_s23 = scalar_lea.hbm (!%p162_p10), %s710_s3, %s418_s11 }
  0x12   : > { %s323_s18 = sshll.u32 (!%p162_p10), %s188_s10, 4  ;;  %s307_s26 = scalar_lea.sflag (!%p162_p10), [#allocation3], %s186_s8  ;;  %s662_s18 = int_to_ptr.vmem [resolvable:$true] %s323_s18 }
  0x13   : > { %s486_s27 = scalar_lea.vmem (!%p162_p10), %s662_s18, 256 }
  0x14   : > { %p487_p12 = scmp.ne.s32.totalorder (!%p162_p10), %s662_s18, %s486_s27 }
  0x16   : > { %s191_s28 = scalar_select %p190_p11, %s556_s15, 1 }
  0x17   : > { %p488_p13 = pnand %p487_p12, %p629_p4  ;;  %s568_s15 = smov [#allocation2]  }
  0x18   : > { %s417_s29 = sshll.u32 %s191_s28, 3  ;;  %s490_s28 = sshll.u32 %s568_s15, 4  ;;  %s491_s28 = int_to_ptr.vmem [resolvable:$false] %s490_s28 }
  0x19   : > { %s197_s5 = scalar_lea.vmem %s707_s0, %s417_s29  ;;  %p489_p0 = pneg %p488_p13 }
  0x1a   : > { %v200_v3 = vld [vmem:[%s197_s5] sm:$0xff]  ;;  %s492_s29 = scalar_lea.vmem %s491_s28, 512  ;;  %p493_p1 = scmp.lt.s32.totalorder %s662_s18, %s491_s28 }
  0x1b   : > { %v209_v4 = vcombine.high %v200_v3, %v200_v3  ;;  %p494_p2 = scmp.lt.s32.totalorder %s492_s29, %s486_s27 }
  0x1d   : > { %407 = vmatprep.subr.msk.mxu0 %vm214_vm0, %v209_v4  ;;  %p495_p3 = por %p494_p2, %p493_p1 }
  0x1e   : > { %408 = vmatpush1.msk.msra.mxu0 %vm214_vm0, %v200_v3 }
  0x1f   : > { %409 = vmatmul.mubr.msk.f32.vlgmr.msra.gmra.mrb[0].mxu0 %vm210_vm1, %v201_v5  ;;  %p496_p5 = pnand %p495_p3, %p489_p0 }
  0x8f   : > { %v206_v6 = vpop.permute.xlu0 %205 }
  0xf2   : > { %v285_v7 = vpop.f32.mrb[0].mxu0 }
  0xf3   : > { %v286_v8 = vadd.f32 %v285_v7, %v206_v6  ;;  %v287_v9 = vpop.f32.mrb[1].mxu0 }
  0xf4   : > { %v288_v10 = vadd.f32 %v287_v9, %v206_v6 }
  0xf5   : > { %290 = vst [vmem:[%s188_s10] sm:$0xff] %v286_v8  ;;  %v410_v11 = vmul.f32 -1.442695, %v286_v8 }
  0xf6   : > { %291 = vst [vmem:[%s188_s10 + $0x8] sm:$0xff] %v288_v10  ;;  %v411_v12 = vmul.f32 -1.442695, %v288_v10 }
  0xf7   : > { %478 = vpow2.f32 %v410_v11 }
  0xf8   : > { %480 = vpow2.f32 %v411_v12 }
 0x101   : > { %v479_v13 = vpop.eup %478 }
 0x102   : > { %v481_v14 = vpop.eup %480  ;;  %v298_v15 = vadd.f32 1.0, %v479_v13 }
 0x103   : > { %v299_v16 = vadd.f32 1.0, %v481_v14 }
 0x104   : > { %482 = vrcp.f32 %v298_v15 }
 0x105   : > { %484 = vrcp.f32 %v299_v16 }
 0x10e   : > { %v483_v17 = vpop.eup %482 }
 0x10f   : > { %v485_v18 = vpop.eup %484  ;;  %304 = vst [vmem:[%s188_s10] sm:$0x30] %v483_v17 }
 0x110   : > { %305 = vst [vmem:[%s188_s10 + $0x8] sm:$0x30] %v485_v18 }
 0x111   : > { %499 = shalt.err (!%p496_p5)
}
 0x112   : > { %s500_s30 = scalar_lea.hbm %s660_s23, 256  ;;  %s504_s6 = scalar_lea.hbm %s710_s3, 512 }
 0x113   : > { %p501_p6 = scmp.ne.s32.totalorder %s660_s23, %s500_s30  ;;  %p505_p10 = scmp.lt.u32.totalorder %s660_s23, %s710_s3 }
 0x114   : > { %p506_p11 = scmp.lt.u32.totalorder %s504_s6, %s500_s30  ;;  %p508_p13 = scmp.lt.u32.totalorder %s500_s30, %s660_s23 }
 0x115   : > { %p502_p7 = pnand %p501_p6, %p629_p4 }
 0x116   : > { %p507_p12 = por %p506_p11, %p505_p10 }
 0x117   : > { %p503_p9 = pneg %p502_p7 }
 0x118   : > { %p509_p0 = por %p508_p13, %p507_p12 }
 0x11a   : > { %p510_p1 = pnand %p509_p0, %p503_p9 }
 0x11c   : > { %513 = shalt.err (!%p510_p1)
}
 0x11d   : > { %419 = dma.vmem_to_hbm [thread:$0]  (%p629_p4), %s662_s18, 256, %s660_s23, %s307_s26  }
 0x11e PF: > { %p425_p2 = scmp.ge.s32.totalorder %s564_s17, 2  ;;  %s335_s9 = sand.u32 1, %s544_s12  }
 0x11f   : > { %s336_s10 = scalar_lea.sflag [#allocation3], %s335_s9 }
 0x120   : > { %p422_p3 = pnand %p425_p2, %p636_p8 }
 0x122   : > { %539 = dma.done.wait (!%p422_p3), %s336_s10, 256  }
 0x123   : > { %541 = vsyncadd (!%p422_p3), %s336_s10, 4294967040  ;;  %s16_s17 = sadd.s32 1, %s564_s17   ;;  %s713_s12 = smov %s548_s13 }
 0x124   : > { %p13_p5 = scmp.ge.s32.totalorder %s16_s17, 4   ;;  %s714_s13 = smov %s552_s14 }
 0x125   : > { %s715_s14 = smov %s642_s25  ;;  %s716_s15 = smov %s560_s16 }
 0x126   : > { %s717_s16 = smov %s719_s20  ;;  %15 = sbr.rel (!%p13_p5) target bundleno = 4 (0x4), region = 67 }
 0x12d   :  { %341 = vsyncpa [#allocation3], 1 }
 0x12e   :  { %343 = vsyncpa [#allocation3 + $0x1], 1 }

</bundles_post_ra>
